<compile_context>
chip_gen: v5e
topology: v5e:2x2
jax: 0.10.0
libtpu: 0.0.40
codegen_flags: <defaults>
</compile_context>

<pallas_src>
import functools

import jax
import jax.numpy as jnp
from jax import lax
from jax.experimental import pallas as pl
from jax.experimental.pallas import tpu as pltpu

BN_EPS = 1e-5
LANE = 128


def _round_up(a, b):
    return -(-a // b) * b


def block_kernel(x_ref, w_ref, gamma_ref, beta_ref, o_ref, *, n_valid):
    """x_ref: (Mp, Kp) bf16 im2col patches (zero-padded rows/cols);
    w_ref: (Kp, Cp) bf16 zero-padded weights; gamma/beta: (1, Cp) f32;
    o_ref: (Mp, Cp) bf16.  n_valid = true number of (N*Ho*Wo) rows."""
    # Single lane-dense MXU matmul, bf16 operands, f32 accumulation.
    acc = jnp.dot(x_ref[...], w_ref[...], preferred_element_type=jnp.float32)

    # Conv bias intentionally omitted: training-mode BN subtracts the batch
    # mean immediately, so a per-channel constant shift cancels exactly.

    # One-pass BatchNorm statistics (padded rows/cols are all-zero and
    # contribute nothing to sum / sum-of-squares; divide by the true count).
    inv_n = jnp.float32(1.0 / n_valid)
    s = jnp.sum(acc, axis=0, keepdims=True)
    ss = jnp.sum(acc * acc, axis=0, keepdims=True)
    mean = s * inv_n
    # Clamp: E[x^2] - mean^2 can go slightly negative from f32 cancellation.
    var = jnp.maximum(ss * inv_n - mean * mean, 0.0)

    # Fold BN into one per-channel scale/shift (tiny (1,Cp) math), then a
    # single scale/shift/ReLU pass over the big accumulator slab.
    scale = gamma_ref[...] * lax.rsqrt(var + BN_EPS)
    shift = beta_ref[...] - mean * scale

    # Lane-dense unmasked bf16 store; stays 2-D (no in-kernel reshape).
    o_ref[...] = jnp.maximum(acc * scale + shift, 0.0).astype(o_ref.dtype)


def block_forward(x_nchw, w_oihw, bias, gamma, beta, *, padding=1):
    """Pallas equivalent of Block.forward. x_nchw: (N, Cin, H, W) float32.
    `bias` is accepted for API parity but mathematically cancelled by
    training-mode BatchNorm, so it is not fed to the kernel."""
    del bias  # cancelled exactly by the batch-mean subtraction in BN
    N, Cin, H, W = x_nchw.shape
    Cout, _, KH, KW = w_oihw.shape
    Ho = H + 2 * padding - KH + 1  # stride 1, dilation 1
    Wo = W + 2 * padding - KW + 1

    M = N * Ho * Wo
    K = KH * KW * Cin
    Mp = _round_up(M, 16)        # bf16 sublane packing (16 rows / vreg)
    Kp = _round_up(K, LANE)      # lane-dense contraction dim
    Cp = _round_up(Cout, LANE)   # lane-dense output channels

    # ---- wrapper-side layout plumbing (done once in HBM by XLA) ----
    # NCHW -> NHWC, cast to bf16 BEFORE the 9x im2col blowup, spatial zero-pad.
    x = jnp.transpose(x_nchw, (0, 2, 3, 1)).astype(jnp.bfloat16)
    x = jnp.pad(x, ((0, 0), (padding, padding), (padding, padding), (0, 0)))

    # im2col: (N, Ho, Wo, KH*KW*Cin) with (kh outer, kw mid, cin inner) order.
    patches = jnp.concatenate(
        [x[:, kh:kh + Ho, kw:kw + Wo, :] for kh in range(KH) for kw in range(KW)],
        axis=-1,
    ).reshape(M, K)
    patches = jnp.pad(patches, ((0, Mp - M), (0, Kp - K)))

    # OIHW -> (KH, KW, Cin, Cout) -> (K, Cout), matching the patch ordering.
    w2d = jnp.transpose(w_oihw, (2, 3, 1, 0)).reshape(K, Cout)
    w2d = jnp.pad(w2d, ((0, Kp - K), (0, Cp - Cout))).astype(jnp.bfloat16)

    gamma_p = jnp.pad(
        gamma.astype(jnp.float32), (0, Cp - Cout), constant_values=1.0
    ).reshape(1, Cp)
    beta_p = jnp.pad(beta.astype(jnp.float32), (0, Cp - Cout)).reshape(1, Cp)

    cost = pl.CostEstimate(
        flops=2 * Mp * Kp * Cp,
        transcendentals=Cp,
        bytes_accessed=(Mp * Kp * 2 + Kp * Cp * 2 + 2 * Cp * 4 + Mp * Cp * 2),
    )

    kern = functools.partial(block_kernel, n_valid=M)
    out2d = pl.pallas_call(
        kern,
        out_shape=jax.ShapeDtypeStruct((Mp, Cp), jnp.bfloat16),
        grid=(1,),  # whole (tiny) problem lives in one VMEM block
        in_specs=[
            pl.BlockSpec((Mp, Kp), lambda i: (0, 0)),
            pl.BlockSpec((Kp, Cp), lambda i: (0, 0)),
            pl.BlockSpec((1, Cp), lambda i: (0, 0)),
            pl.BlockSpec((1, Cp), lambda i: (0, 0)),
        ],
        out_specs=pl.BlockSpec((Mp, Cp), lambda i: (0, 0)),
        compiler_params=pltpu.CompilerParams(
            dimension_semantics=("arbitrary",)
        ),
        cost_estimate=cost,
    )(patches, w2d, gamma_p, beta_p)

    out = out2d[:M, :Cout].reshape(N, Ho, Wo, Cout).astype(x_nchw.dtype)
    return jnp.transpose(out, (0, 3, 1, 2))  # back to NCHW


def block_reference(x, w, b, gamma, beta):
    """Pure-JAX reference (conv + bias + training-mode BN + ReLU)."""
    y = lax.conv_general_dilated(
        x, w, window_strides=(1, 1), padding=((1, 1), (1, 1)),
        dimension_numbers=("NCHW", "OIHW", "NCHW"),
        precision=lax.Precision.HIGHEST,
    )
    y = y + b[None, :, None, None]
    mean = jnp.mean(y, axis=(0, 2, 3), keepdims=True)
    var = jnp.var(y, axis=(0, 2, 3), keepdims=True)
    y = (y - mean) * lax.rsqrt(var + BN_EPS)
    y = y * gamma[None, :, None, None] + beta[None, :, None, None]
    return jnp.maximum(y, 0.0)


if __name__ == "__main__":
    # Small shapes implied by the module: Block(in_plane=4, plane=8) on (2,4,16,16)
    N, Cin, Cout, H, W, K = 2, 4, 8, 16, 16, 3

    key = jax.random.PRNGKey(0)
    kx, kw, kb, kg, kbe = jax.random.split(key, 5)
    x = jax.random.normal(kx, (N, Cin, H, W), jnp.float32)
    w = jax.random.normal(kw, (Cout, Cin, K, K), jnp.float32) * 0.1   # conv1.weight
    b = jax.random.normal(kb, (Cout,), jnp.float32) * 0.1             # conv1.bias
    gamma = 1.0 + 0.1 * jax.random.normal(kg, (Cout,), jnp.float32)   # bn1.weight
    beta = 0.1 * jax.random.normal(kbe, (Cout,), jnp.float32)         # bn1.bias

    out = jax.block_until_ready(block_forward(x, w, b, gamma, beta))
    ref = jax.block_until_ready(block_reference(x, w, b, gamma, beta))

    assert out.shape == (N, Cout, H, W)
    # bf16 matmul operands + bf16 output vs f32 HIGHEST-precision reference.
    assert jnp.allclose(out, ref, rtol=5e-2, atol=5e-2), "mismatch vs JAX reference"

    print("KERNEL_OK")
</pallas_src>

<mosaic_0001>
module attributes {stable_mosaic.version = 11 : i64} {
  func.func @block_kernel(%arg0: i32, %arg1: memref<512x128xbf16, #tpu.memory_space<vmem>>, %arg2: memref<128x128xbf16, #tpu.memory_space<vmem>>, %arg3: memref<1x128xf32, #tpu.memory_space<vmem>>, %arg4: memref<1x128xf32, #tpu.memory_space<vmem>>, %arg5: memref<512x128xbf16, #tpu.memory_space<vmem>>) attributes {dimension_semantics = [#tpu.dimension_semantics<arbitrary>], iteration_bounds = array<i64: 1>, scalar_prefetch = 0 : i64, scratch_operands = 0 : i64, tpu.core_type = #tpu.core_type<tc>, window_params = [{pipeline_mode = #tpu.pipeline_mode<synchronous>, transform_indices = @transform_0, window_bounds = array<i64: 512, 128>}, {pipeline_mode = #tpu.pipeline_mode<synchronous>, transform_indices = @transform_1, window_bounds = array<i64: 128, 128>}, {pipeline_mode = #tpu.pipeline_mode<synchronous>, transform_indices = @transform_2, window_bounds = array<i64: 1, 128>}, {pipeline_mode = #tpu.pipeline_mode<synchronous>, transform_indices = @transform_3, window_bounds = array<i64: 1, 128>}, {pipeline_mode = #tpu.pipeline_mode<synchronous>, transform_indices = @transform_4, window_bounds = array<i64: 512, 128>}]} {
    %c0 = arith.constant 0 : index
    %c0_0 = arith.constant 0 : index
    %0 = vector.load %arg1[%c0, %c0_0] : memref<512x128xbf16, #tpu.memory_space<vmem>>, vector<512x128xbf16>
    %c0_1 = arith.constant 0 : index
    %c0_2 = arith.constant 0 : index
    %1 = vector.load %arg2[%c0_1, %c0_2] : memref<128x128xbf16, #tpu.memory_space<vmem>>, vector<128x128xbf16>
    %cst = arith.constant dense<0.000000e+00> : vector<512x128xf32>
    %2 = tpu.matmul %0, %1, %cst {dimension_numbers = #tpu.dot_dimension_numbers<[1], [0], [0], [1], [0, 0, 1, 1], [], []>} : vector<512x128xbf16>, vector<128x128xbf16>, vector<512x128xf32> -> vector<512x128xf32>
    %cst_3 = arith.constant dense<0.000000e+00> : vector<128xf32>
    %3 = vector.multi_reduction <add>, %2, %cst_3 [0] : vector<512x128xf32> to vector<128xf32>
    %4 = vector.shape_cast %3 : vector<128xf32> to vector<1x128xf32>
    %5 = arith.mulf %2, %2 : vector<512x128xf32>
    %cst_4 = arith.constant dense<0.000000e+00> : vector<128xf32>
    %6 = vector.multi_reduction <add>, %5, %cst_4 [0] : vector<512x128xf32> to vector<128xf32>
    %7 = vector.shape_cast %6 : vector<128xf32> to vector<1x128xf32>
    %cst_5 = arith.constant 0.001953125 : f32
    %8 = vector.broadcast %cst_5 : f32 to vector<1x128xf32>
    %9 = arith.mulf %4, %8 : vector<1x128xf32>
    %cst_6 = arith.constant 0.001953125 : f32
    %10 = vector.broadcast %cst_6 : f32 to vector<1x128xf32>
    %11 = arith.mulf %7, %10 : vector<1x128xf32>
    %12 = arith.mulf %9, %9 : vector<1x128xf32>
    %13 = arith.subf %11, %12 : vector<1x128xf32>
    %cst_7 = arith.constant 0.000000e+00 : f32
    %14 = vector.broadcast %cst_7 : f32 to vector<1x128xf32>
    %15 = arith.maximumf %13, %14 : vector<1x128xf32>
    %c0_8 = arith.constant 0 : index
    %c0_9 = arith.constant 0 : index
    %16 = vector.load %arg3[%c0_8, %c0_9] : memref<1x128xf32, #tpu.memory_space<vmem>>, vector<1x128xf32>
    %cst_10 = arith.constant 9.99999974E-6 : f32
    %17 = vector.broadcast %cst_10 : f32 to vector<1x128xf32>
    %18 = arith.addf %15, %17 : vector<1x128xf32>
    %19 = math.rsqrt %18 : vector<1x128xf32>
    %20 = arith.mulf %16, %19 : vector<1x128xf32>
    %c0_11 = arith.constant 0 : index
    %c0_12 = arith.constant 0 : index
    %21 = vector.load %arg4[%c0_11, %c0_12] : memref<1x128xf32, #tpu.memory_space<vmem>>, vector<1x128xf32>
    %22 = arith.mulf %9, %20 : vector<1x128xf32>
    %23 = arith.subf %21, %22 : vector<1x128xf32>
    %24 = vector.broadcast %20 : vector<1x128xf32> to vector<512x128xf32>
    %25 = arith.mulf %2, %24 : vector<512x128xf32>
    %26 = vector.broadcast %23 : vector<1x128xf32> to vector<512x128xf32>
    %27 = arith.addf %25, %26 : vector<512x128xf32>
    %cst_13 = arith.constant 0.000000e+00 : f32
    %28 = vector.broadcast %cst_13 : f32 to vector<512x128xf32>
    %29 = arith.maximumf %27, %28 : vector<512x128xf32>
    %30 = arith.truncf %29 : vector<512x128xf32> to vector<512x128xbf16>
    %c0_14 = arith.constant 0 : index
    %c0_15 = arith.constant 0 : index
    %31 = vector.load %arg5[%c0_14, %c0_15] : memref<512x128xbf16, #tpu.memory_space<vmem>>, vector<512x128xbf16>
    tpu.vector_store %arg5[%c0_14, %c0_15], %30 {strides = array<i32>} : memref<512x128xbf16, #tpu.memory_space<vmem>>, vector<512x128xbf16>,
    return
  }
  func.func @transform_0(%arg0: i32) -> (i32, i32) {
    %c0_i32 = arith.constant 0 : i32
    %c0_i32_0 = arith.constant 0 : i32
    %c0_i32_1 = arith.constant 0 : i32
    return %c0_i32, %c0_i32_0 : i32, i32
  }
  func.func @transform_1(%arg0: i32) -> (i32, i32) {
    %c0_i32 = arith.constant 0 : i32
    %c0_i32_0 = arith.constant 0 : i32
    %c0_i32_1 = arith.constant 0 : i32
    return %c0_i32, %c0_i32_0 : i32, i32
  }
  func.func @transform_2(%arg0: i32) -> (i32, i32) {
    %c0_i32 = arith.constant 0 : i32
    %c0_i32_0 = arith.constant 0 : i32
    %c0_i32_1 = arith.constant 0 : i32
    return %c0_i32, %c0_i32_0 : i32, i32
  }
  func.func @transform_3(%arg0: i32) -> (i32, i32) {
    %c0_i32 = arith.constant 0 : i32
    %c0_i32_0 = arith.constant 0 : i32
    %c0_i32_1 = arith.constant 0 : i32
    return %c0_i32, %c0_i32_0 : i32, i32
  }
  func.func @transform_4(%arg0: i32) -> (i32, i32) {
    %c0_i32 = arith.constant 0 : i32
    %c0_i32_0 = arith.constant 0 : i32
    %c0_i32_1 = arith.constant 0 : i32
    return %c0_i32, %c0_i32_0 : i32, i32
  }
}

</mosaic_0001>

<bundles_post_ra>
// kernel: tpu_custom_call.1
= control target key start
LH: loop header
LB: loop body
LE: loop exit
PB: predicated region body
PF: predicated region fallthrough
CT: control target
= control target key end

     0   :  { %9 = vsyncpa [#allocation3], 0  ;;  %s2442_s0 = inlined_call_operand.hbm [shape: bf16[512,128], index: 0, kind: input, shape index: {}]   ;;  %s2443_s1 = inlined_call_operand.hbm [shape: bf16[128,128], index: 1, kind: input, shape index: {}]   ;;  %s2444_s2 = inlined_call_operand.vmem [shape: f32[1,128], index: 2, kind: input, shape index: {}]   ;;  %s2445_s3 = inlined_call_operand.vmem [shape: f32[1,128], index: 3, kind: input, shape index: {}]   ;;  %s2446_s4 = inlined_call_operand.hbm [shape: bf16[512,128], index: 4, kind: output, shape index: {}]  }
   0x1   :  { %10 = vsyncpa [#allocation6], 0 }
   0x2   :  { %11 = vsyncpa [#allocation4], 0  ;;  %s16_s17 = sshll.u32 %s2442_s0, 4  ;;  %s1608_s18 = smov [#allocation2]   ;;  %s17_s17 = int_to_ptr.hbm [resolvable:$true] %s16_s17 }
   0x3   :  { %s18_s19 = sshll.u32 %s1608_s18, 4  ;;  %s29_s22 = sshll.u32 %s2443_s1, 4  ;;  %s19_s19 = int_to_ptr.vmem [resolvable:$true] %s18_s19  ;;  %s30_s22 = int_to_ptr.hbm [resolvable:$true] %s29_s22 }
   0x4   :  { %s1609_s23 = smov 64   ;;  %s1610_s24 = smov 4  }
   0x5   :  { %24 = dma.hbm_to_vmem [thread:$0]  %s17_s17, 4096, %s19_s19, [#allocation3], %s1609_s23, %s1609_s23, %s1610_s24  }
   0x6   :  { %s1611_s25 = smov [#allocation5]  }
   0x7   :  { %s31_s26 = sshll.u32 %s1611_s25, 4  ;;  %s32_s26 = int_to_ptr.vmem [resolvable:$true] %s31_s26 }
   0x8   :  { %37 = dma.hbm_to_vmem [thread:$0]  %s30_s22, 1024, %s32_s26, [#allocation6], %s1609_s23, %s1609_s23, %s1610_s24  }
   0x9   :  { %1602 = dma.done.wait [#allocation3], 4096  }
   0xa   :  { %1603 = vsyncadd [#allocation3], 4294963200 }
   0xb   :  { %1604 = dma.done.wait [#allocation6], 1024  }
   0xc   :  { %1605 = vsyncadd [#allocation6], 4294966272  ;;  %v1307_v0 = vld [vmem:[#allocation5 + $0x38] sm:$0xff]  ;;  %v1306_v1 = vld [vmem:[#allocation5 + $0x30] sm:$0xff]  ;;  %s1094_s5 = sshll.u32 %s2446_s4, 4  ;;  %s1095_s5 = int_to_ptr.hbm [resolvable:$true] %s1094_s5 }
   0xd   :  { %370 = vmatpush.bf16.msra.mxu0 %v1307_v0  ;;  %1499 = vmatpush.bf16.msra.mxu1 %v1307_v0  ;;  %v1305_v2 = vld [vmem:[#allocation5 + $0x28] sm:$0xff]  ;;  %v1304_v3 = vld [vmem:[#allocation5 + $0x20] sm:$0xff]  ;;  %v1303_v4 = vld [vmem:[#allocation5 + $0x18] sm:$0xff] }
   0xe   :  { %1500 = vmatpush.bf16.msra.mxu2 %v1307_v0  ;;  %1501 = vmatpush.bf16.msra.mxu3 %v1307_v0  ;;  %v1302_v5 = vld [vmem:[#allocation5 + $0x10] sm:$0xff]  ;;  %v1301_v6 = vld [vmem:[#allocation5 + $0x8] sm:$0xff]  ;;  %v1300_v7 = vld [vmem:[#allocation5] sm:$0xff] }
   0xf   :  { %v1268_v8 = vld [vmem:[#allocation2] sm:$0xff]  ;;  %v1269_v10 = vld [vmem:[#allocation2 + $0x8] sm:$0xff]  ;;  %v1270_v13 = vld [vmem:[#allocation2 + $0x10] sm:$0xff] }
  0x10   :  { %v1276_v9 = vld [vmem:[#allocation2 + $0x40] sm:$0xff]  ;;  %v1277_v11 = vld [vmem:[#allocation2 + $0x48] sm:$0xff]  ;;  %v1278_v14 = vld [vmem:[#allocation2 + $0x50] sm:$0xff] }
  0x11   :  { %371 = vmatpush.bf16.msra.mxu0 %v1306_v1  ;;  %1502 = vmatpush.bf16.msra.mxu1 %v1306_v1  ;;  %v1284_v12 = vld [vmem:[#allocation2 + $0x80] sm:$0xff]  ;;  %v1285_v15 = vld [vmem:[#allocation2 + $0x88] sm:$0xff]  ;;  %v1271_v16 = vld [vmem:[#allocation2 + $0x18] sm:$0xff] }
  0x12   :  { %1503 = vmatpush.bf16.msra.mxu2 %v1306_v1  ;;  %1504 = vmatpush.bf16.msra.mxu3 %v1306_v1  ;;  %v1279_v17 = vld [vmem:[#allocation2 + $0x58] sm:$0xff]  ;;  %v1286_v18 = vld [vmem:[#allocation2 + $0x90] sm:$0xff]  ;;  %v1292_v19 = vld [vmem:[#allocation2 + $0xc0] sm:$0xff] }
  0x13   :  { %v1272_v20 = vld [vmem:[#allocation2 + $0x20] sm:$0xff]  ;;  %v1287_v22 = vld [vmem:[#allocation2 + $0x98] sm:$0xff]  ;;  %v1293_v23 = vld [vmem:[#allocation2 + $0xc8] sm:$0xff] }
  0x14   :  { %v1280_v21 = vld [vmem:[#allocation2 + $0x60] sm:$0xff]  ;;  %v1273_v24 = vld [vmem:[#allocation2 + $0x28] sm:$0xff]  ;;  %v1294_v27 = vld [vmem:[#allocation2 + $0xd0] sm:$0xff] }
  0x15   :  { %372 = vmatpush.bf16.msra.mxu0 %v1305_v2  ;;  %1505 = vmatpush.bf16.msra.mxu1 %v1305_v2  ;;  %v1281_v25 = vld [vmem:[#allocation2 + $0x68] sm:$0xff]  ;;  %v1288_v26 = vld [vmem:[#allocation2 + $0xa0] sm:$0xff]  ;;  %v1274_v28 = vld [vmem:[#allocation2 + $0x30] sm:$0xff] }
  0x16   :  { %1506 = vmatpush.bf16.msra.mxu2 %v1305_v2  ;;  %1507 = vmatpush.bf16.msra.mxu3 %v1305_v2  ;;  %v1282_v29 = vld [vmem:[#allocation2 + $0x70] sm:$0xff]  ;;  %v1289_v30 = vld [vmem:[#allocation2 + $0xa8] sm:$0xff]  ;;  %v1295_v31 = vld [vmem:[#allocation2 + $0xd8] sm:$0xff] }
  0x17   :  { %v1275_v32 = vld [vmem:[#allocation2 + $0x38] sm:$0xff]  ;;  %v1290_v34 = vld [vmem:[#allocation2 + $0xb0] sm:$0xff]  ;;  %v1296_v35 = vld [vmem:[#allocation2 + $0xe0] sm:$0xff] }
  0x18   :  { %v1283_v33 = vld [vmem:[#allocation2 + $0x78] sm:$0xff]  ;;  %v1297_v39 = vld [vmem:[#allocation2 + $0xe8] sm:$0xff]  ;;  %v1298_v43 = vld [vmem:[#allocation2 + $0xf0] sm:$0xff] }
  0x19   :  { %373 = vmatpush.bf16.msra.mxu0 %v1304_v3  ;;  %1508 = vmatpush.bf16.msra.mxu1 %v1304_v3  ;;  %v1291_v38 = vld [vmem:[#allocation2 + $0xb8] sm:$0xff] }
  0x1a   :  { %1509 = vmatpush.bf16.msra.mxu2 %v1304_v3  ;;  %1510 = vmatpush.bf16.msra.mxu3 %v1304_v3  ;;  %v1299_v49 = vld [vmem:[#allocation2 + $0xf8] sm:$0xff] }
  0x1d   :  { %374 = vmatpush.bf16.msra.mxu0 %v1303_v4  ;;  %1511 = vmatpush.bf16.msra.mxu1 %v1303_v4 }
  0x1e   :  { %1512 = vmatpush.bf16.msra.mxu2 %v1303_v4  ;;  %1513 = vmatpush.bf16.msra.mxu3 %v1303_v4 }
  0x21   :  { %375 = vmatpush.bf16.msra.mxu0 %v1302_v5  ;;  %1514 = vmatpush.bf16.msra.mxu1 %v1302_v5 }
  0x22   :  { %1515 = vmatpush.bf16.msra.mxu2 %v1302_v5  ;;  %1516 = vmatpush.bf16.msra.mxu3 %v1302_v5 }
  0x25   :  { %376 = vmatpush.bf16.msra.mxu0 %v1301_v6  ;;  %1517 = vmatpush.bf16.msra.mxu1 %v1301_v6 }
  0x26   :  { %1518 = vmatpush.bf16.msra.mxu2 %v1301_v6  ;;  %1519 = vmatpush.bf16.msra.mxu3 %v1301_v6 }
  0x29   :  { %377 = vmatpush.bf16.msra.mxu0 %v1300_v7  ;;  %1520 = vmatpush.bf16.msra.mxu1 %v1300_v7 }
  0x2a   :  { %1521 = vmatpush.bf16.msra.mxu2 %v1300_v7  ;;  %1522 = vmatpush.bf16.msra.mxu3 %v1300_v7 }
  0x2c   :  { %378 = vmatmul.bf16.vlgmr.msra.gmra.mxu0 %v1268_v8  ;;  %418 = vmatmul.bf16.vlgmr.msra.gmra.mxu1 %v1276_v9 }
  0x2d   :  { %458 = vmatmul.bf16.vlgmr.msra.gmra.mxu2 %v1284_v12  ;;  %498 = vmatmul.bf16.vlgmr.msra.gmra.mxu3 %v1292_v19 }
  0x3c   :  { %383 = vmatmul.bf16.gmra.mxu0 %v1269_v10  ;;  %423 = vmatmul.bf16.gmra.mxu1 %v1277_v11 }
  0x3d   :  { %463 = vmatmul.bf16.gmra.mxu2 %v1285_v15  ;;  %503 = vmatmul.bf16.gmra.mxu3 %v1293_v23 }
  0x4c   :  { %388 = vmatmul.bf16.gmra.mxu0 %v1270_v13  ;;  %428 = vmatmul.bf16.gmra.mxu1 %v1278_v14 }
  0x4d   :  { %468 = vmatmul.bf16.gmra.mxu2 %v1286_v18  ;;  %508 = vmatmul.bf16.gmra.mxu3 %v1294_v27 }
  0x5c   :  { %393 = vmatmul.bf16.gmra.mxu0 %v1271_v16  ;;  %433 = vmatmul.bf16.gmra.mxu1 %v1279_v17 }
  0x5d   :  { %473 = vmatmul.bf16.gmra.mxu2 %v1287_v22  ;;  %513 = vmatmul.bf16.gmra.mxu3 %v1295_v31 }
  0x6c   :  { %398 = vmatmul.bf16.gmra.mxu0 %v1272_v20  ;;  %438 = vmatmul.bf16.gmra.mxu1 %v1280_v21 }
  0x6d   :  { %478 = vmatmul.bf16.gmra.mxu2 %v1288_v26  ;;  %518 = vmatmul.bf16.gmra.mxu3 %v1296_v35 }
  0x7c   :  { %403 = vmatmul.bf16.gmra.mxu0 %v1273_v24  ;;  %443 = vmatmul.bf16.gmra.mxu1 %v1281_v25 }
  0x7d   :  { %483 = vmatmul.bf16.gmra.mxu2 %v1289_v30  ;;  %523 = vmatmul.bf16.gmra.mxu3 %v1297_v39 }
  0x8c   :  { %408 = vmatmul.bf16.gmra.mxu0 %v1274_v28  ;;  %448 = vmatmul.bf16.gmra.mxu1 %v1282_v29 }
  0x8d   :  { %488 = vmatmul.bf16.gmra.mxu2 %v1290_v34  ;;  %528 = vmatmul.bf16.gmra.mxu3 %v1298_v43 }
  0x9c   :  { %413 = vmatmul.bf16.gmra.mxu0 %v1275_v32  ;;  %453 = vmatmul.bf16.gmra.mxu1 %v1283_v33 }
  0x9d   :  { %493 = vmatmul.bf16.gmra.mxu2 %v1291_v38  ;;  %533 = vmatmul.bf16.gmra.mxu3 %v1299_v49 }
  0xa9   :  { %v1650_v36 = vpop.f32.mrf.mxu0  ;;  %v1652_v37 = vpop.f32.mrf.mxu1 }
  0xaa   :  { %v608_v9 = vmul.f32 %v1650_v36, %v1650_v36 }
  0xb0   :  { %v1668_v48 = vpop.f32.mrf.mxu2  ;;  %v1690_v60 = vpop.f32.mrf.mxu3 }
  0xb1   :  { %v1654_v40 = vpop.f32.mrf.mxu0  ;;  %v1656_v41 = vpop.f32.mrf.mxu1 }
  0xb2   :  { %v609_v7 = vmul.f32 %v1654_v40, %v1654_v40  ;;  %v539_v10 = vadd.f32 %v1654_v40, %v1650_v36 }
  0xb4   :  { %v672_v13 = vadd.f32 %v609_v7, %v608_v9 }
  0xb8   :  { %v1674_v52 = vpop.f32.mrf.mxu2  ;;  %v1698_v0 = vpop.f32.mrf.mxu3 }
  0xb9   :  { %v1658_v42 = vpop.f32.mrf.mxu0  ;;  %v1660_v44 = vpop.f32.mrf.mxu1 }
  0xba   :  { %v610_v11 = vmul.f32 %v1658_v42, %v1658_v42  ;;  %v540_v14 = vadd.f32 %v539_v10, %v1658_v42 }
  0xbc   :  { %v673_v17 = vadd.f32 %v672_v13, %v610_v11 }
  0xc0   :  { %v1680_v55 = vpop.f32.mrf.mxu2  ;;  %v1706_v4 = vpop.f32.mrf.mxu3 }
  0xc1   :  { %v1662_v45 = vpop.f32.mrf.mxu0  ;;  %v1664_v46 = vpop.f32.mrf.mxu1 }
  0xc2   :  { %v611_v15 = vmul.f32 %v1662_v45, %v1662_v45  ;;  %v541_v18 = vadd.f32 %v540_v14, %v1662_v45 }
  0xc4   :  { %v674_v20 = vadd.f32 %v673_v17, %v611_v15 }
  0xc8   :  { %v1686_v58 = vpop.f32.mrf.mxu2  ;;  %v1722_v12 = vpop.f32.mrf.mxu3 }
  0xc9   :  { %v1666_v47 = vpop.f32.mrf.mxu0  ;;  %v1672_v51 = vpop.f32.mrf.mxu1  ;;  %2470 = vst [vmem:[#allocation11_spill] sm:$0xff] %v1686_v58 }
  0xca   :  { %2474 = vst [vmem:[#allocation15_spill] sm:$0xff] %v1722_v12  ;;  %v612_v19 = vmul.f32 %v1666_v47, %v1666_v47  ;;  %v542_v21 = vadd.f32 %v541_v18, %v1666_v47 }
  0xcc   :  { %v675_v24 = vadd.f32 %v674_v20, %v612_v19 }
  0xd0   :  { %v1696_v63 = vpop.f32.mrf.mxu2  ;;  %v1747_v32 = vpop.f32.mrf.mxu3 }
  0xd1   :  { %v1670_v50 = vpop.f32.mrf.mxu0  ;;  %v1678_v54 = vpop.f32.mrf.mxu1  ;;  %2471 = vst [vmem:[#allocation12_spill] sm:$0xff] %v1696_v63 }
  0xd2   :  { %v613_v22 = vmul.f32 %v1670_v50, %v1670_v50  ;;  %v543_v25 = vadd.f32 %v542_v21, %v1670_v50  ;;  %2476 = vst [vmem:[#allocation17_spill] sm:$0xff] %v1747_v32 }
  0xd4   :  { %v676_v28 = vadd.f32 %v675_v24, %v613_v22 }
  0xd8   :  { %v1704_v3 = vpop.f32.mrf.mxu2  ;;  %v1770_v21 = vpop.f32.mrf.mxu3 }
  0xd9   :  { %v1676_v53 = vpop.f32.mrf.mxu0  ;;  %v1684_v57 = vpop.f32.mrf.mxu1  ;;  %2478 = vst [vmem:[#allocation19_spill] sm:$0xff] %v1770_v21 }
  0xda   :  { %v614_v26 = vmul.f32 %v1676_v53, %v1676_v53  ;;  %v544_v29 = vadd.f32 %v543_v25, %v1676_v53 }
  0xdc   :  { %v677_v33 = vadd.f32 %v676_v28, %v614_v26 }
  0xe0   :  { %v1714_v8 = vpop.f32.mrf.mxu2 }
  0xe1   :  { %v1682_v56 = vpop.f32.mrf.mxu0  ;;  %v1692_v61 = vpop.f32.mrf.mxu1 }
  0xe2   :  { %v615_v30 = vmul.f32 %v1682_v56, %v1682_v56  ;;  %v545_v34 = vadd.f32 %v544_v29, %v1682_v56 }
  0xe4   :  { %v678_v38 = vadd.f32 %v677_v33, %v615_v30 }
  0xe8   :  { %v1740_v27 = vpop.f32.mrf.mxu2 }
  0xe9   :  { %v1688_v59 = vpop.f32.mrf.mxu0  ;;  %v1702_v2 = vpop.f32.mrf.mxu1 }
  0xea   :  { %2472 = vst [vmem:[#allocation13_spill] sm:$0xff] %v1702_v2  ;;  %v616_v35 = vmul.f32 %v1688_v59, %v1688_v59  ;;  %v546_v39 = vadd.f32 %v545_v34, %v1688_v59 }
  0xec   :  { %v679_v49 = vadd.f32 %v678_v38, %v616_v35 }
  0xf0   :  { %v1765_v17 = vpop.f32.mrf.mxu2 }
  0xf1   :  { %v1694_v62 = vpop.f32.mrf.mxu0  ;;  %v1710_v6 = vpop.f32.mrf.mxu1  ;;  %2477 = vst [vmem:[#allocation18_spill] sm:$0xff] %v1765_v17 }
  0xf2   :  { %2473 = vst [vmem:[#allocation14_spill] sm:$0xff] %v1710_v6  ;;  %v617_v43 = vmul.f32 %v1694_v62, %v1694_v62  ;;  %v547_v7 = vadd.f32 %v546_v39, %v1694_v62 }
  0xf4   :  { %v680_v11 = vadd.f32 %v679_v49, %v617_v43 }
  0xf8   :  { %v1786_v49 = vpop.f32.mrf.mxu2 }
  0xf9   :  { %v1700_v1 = vpop.f32.mrf.mxu0  ;;  %v1735_v23 = vpop.f32.mrf.mxu1  ;;  %2479 = vst [vmem:[#allocation20_spill] sm:$0xff] %v1786_v49 }
  0xfa   :  { %2475 = vst [vmem:[#allocation16_spill] sm:$0xff] %v1735_v23  ;;  %v618_v9 = vmul.f32 %v1700_v1, %v1700_v1  ;;  %v548_v13 = vadd.f32 %v547_v7, %v1700_v1  ;;  %v624_v7 = vmul.f32 %v1652_v37, %v1652_v37 }
  0xfc   :  { %v681_v18 = vadd.f32 %v680_v11, %v618_v9 }
 0x101   :  { %v1708_v5 = vpop.f32.mrf.mxu0  ;;  %v1758_v10 = vpop.f32.mrf.mxu1 }
 0x102   :  { %v619_v14 = vmul.f32 %v1708_v5, %v1708_v5  ;;  %v549_v19 = vadd.f32 %v548_v13, %v1708_v5  ;;  %v1791_v13 = vpop.f32.mrf.mxu3 }
 0x103   :  { %2480 = vst [vmem:[#allocation21_spill] sm:$0xff] %v1791_v13 }
 0x104   :  { %v682_v22 = vadd.f32 %v681_v18, %v619_v14  ;;  %v625_v14 = vmul.f32 %v1656_v41, %v1656_v41 }
 0x109   :  { %v1727_v16 = vpop.f32.mrf.mxu0  ;;  %v1781_v35 = vpop.f32.mrf.mxu1 }
 0x10a   :  { %v620_v20 = vmul.f32 %v1727_v16, %v1727_v16  ;;  %v550_v24 = vadd.f32 %v549_v19, %v1727_v16 }
 0x10c   :  { %v683_v26 = vadd.f32 %v682_v22, %v620_v20  ;;  %v626_v20 = vmul.f32 %v1660_v44, %v1660_v44 }
 0x111   :  { %v1745_v31 = vpop.f32.mrf.mxu0 }
 0x112   :  { %v621_v25 = vmul.f32 %v1745_v31, %v1745_v31  ;;  %v551_v28 = vadd.f32 %v550_v24, %v1745_v31 }
 0x114   :  { %v684_v30 = vadd.f32 %v683_v26, %v621_v25  ;;  %v627_v25 = vmul.f32 %v1664_v46, %v1664_v46 }
 0x119   :  { %v1763_v15 = vpop.f32.mrf.mxu0 }
 0x11a   :  { %v622_v29 = vmul.f32 %v1763_v15, %v1763_v15  ;;  %v552_v33 = vadd.f32 %v551_v28, %v1763_v15 }
 0x11c   :  { %v685_v38 = vadd.f32 %v684_v30, %v622_v29  ;;  %v1802_v29 = vpop.f32.mrf.mxu1  ;;  %v628_v30 = vmul.f32 %v1672_v51, %v1672_v51 }
 0x11d   :  { %2481 = vst [vmem:[#allocation22_spill] sm:$0xff] %v1802_v29 }
 0x121   :  { %v1779_v34 = vpop.f32.mrf.mxu0 }
 0x122   :  { %v553_v39 = vadd.f32 %v552_v33, %v1779_v34  ;;  %v623_v43 = vmul.f32 %v1779_v34, %v1779_v34 }
 0x124   :  { %v554_v9 = vadd.f32 %v553_v39, %v1652_v37  ;;  %v686_v11 = vadd.f32 %v685_v38, %v623_v43  ;;  %v1807_v39 = vpop.f32.mrf.mxu2  ;;  %v629_v43 = vmul.f32 %v1678_v54, %v1678_v54 }
 0x126   :  { %v555_v18 = vadd.f32 %v554_v9, %v1656_v41  ;;  %v687_v19 = vadd.f32 %v686_v11, %v624_v7  ;;  %v1812_v11 = vpop.f32.mrf.mxu3 }
 0x127   :  { %2482 = vst [vmem:[#allocation23_spill] sm:$0xff] %v1812_v11 }
 0x128   :  { %v556_v22 = vadd.f32 %v555_v18, %v1660_v44  ;;  %v688_v24 = vadd.f32 %v687_v19, %v625_v14  ;;  %v630_v14 = vmul.f32 %v1684_v57, %v1684_v57 }
 0x12a   :  { %v557_v26 = vadd.f32 %v556_v22, %v1664_v46  ;;  %v689_v28 = vadd.f32 %v688_v24, %v626_v20  ;;  %v631_v20 = vmul.f32 %v1692_v61, %v1692_v61 }
 0x12c   :  { %v558_v33 = vadd.f32 %v557_v26, %v1672_v51  ;;  %v690_v38 = vadd.f32 %v689_v28, %v627_v25  ;;  %v632_v25 = vmul.f32 %v1702_v2, %v1702_v2 }
 0x12e   :  { %v559_v7 = vadd.f32 %v558_v33, %v1678_v54  ;;  %v691_v9 = vadd.f32 %v690_v38, %v628_v30  ;;  %v1823_v30 = vpop.f32.mrf.mxu1  ;;  %v633_v33 = vmul.f32 %v1710_v6, %v1710_v6 }
 0x12f   :  { %2483 = vst [vmem:[#allocation24_spill] sm:$0xff] %v1823_v30 }
 0x130   :  { %v692_v18 = vadd.f32 %v691_v9, %v629_v43  ;;  %v560_v19 = vadd.f32 %v559_v7, %v1684_v57  ;;  %v1828_v7 = vpop.f32.mrf.mxu2  ;;  %v634_v9 = vmul.f32 %v1735_v23, %v1735_v23 }
 0x132   :  { %v561_v22 = vadd.f32 %v560_v19, %v1692_v61  ;;  %v693_v24 = vadd.f32 %v692_v18, %v630_v14  ;;  %v1833_v19 = vpop.f32.mrf.mxu3 }
 0x133   :  { %2484 = vst [vmem:[#allocation25_spill] sm:$0xff] %v1833_v19 }
 0x134   :  { %v562_v26 = vadd.f32 %v561_v22, %v1702_v2  ;;  %v694_v28 = vadd.f32 %v693_v24, %v631_v20  ;;  %v635_v20 = vmul.f32 %v1758_v10, %v1758_v10 }
 0x136   :  { %v563_v38 = vadd.f32 %v562_v26, %v1710_v6  ;;  %v695_v43 = vadd.f32 %v694_v28, %v632_v25  ;;  %v636_v25 = vmul.f32 %v1781_v35, %v1781_v35 }
 0x138   :  { %v564_v14 = vadd.f32 %v563_v38, %v1735_v23  ;;  %v696_v18 = vadd.f32 %v695_v43, %v633_v33  ;;  %v637_v33 = vmul.f32 %v1802_v29, %v1802_v29  ;;  %v1844_v38 = vpop.f32.mrf.mxu1 }
 0x139   :  { %2485 = vst [vmem:[#allocation26_spill] sm:$0xff] %v1844_v38 }
 0x13a   :  { %v565_v22 = vadd.f32 %v564_v14, %v1758_v10  ;;  %v697_v24 = vadd.f32 %v696_v18, %v634_v9  ;;  %v638_v9 = vmul.f32 %v1823_v30, %v1823_v30  ;;  %v1849_v14 = vpop.f32.mrf.mxu2 }
 0x13c   :  { %v566_v2 = vadd.f32 %v565_v22, %v1781_v35  ;;  %v698_v26 = vadd.f32 %v697_v24, %v635_v20  ;;  %v639_v20 = vmul.f32 %v1844_v38, %v1844_v38  ;;  %v640_v24 = vmul.f32 %v1668_v48, %v1668_v48 }
 0x13e   :  { %v699_v28 = vadd.f32 %v698_v26, %v636_v25  ;;  %v567_v6 = vadd.f32 %v566_v2, %v1802_v29  ;;  %v1854_v2 = vpop.f32.mrf.mxu3 }
 0x13f   :  { %2486 = vst [vmem:[#allocation27_spill] sm:$0xff] %v1854_v2 }
 0x140   :  { %v700_v43 = vadd.f32 %v699_v28, %v637_v33  ;;  %v568_v23 = vadd.f32 %v567_v6, %v1823_v30  ;;  %v641_v6 = vmul.f32 %v1674_v52, %v1674_v52 }
 0x142   :  { %v701_v18 = vadd.f32 %v700_v43, %v638_v9  ;;  %v569_v22 = vadd.f32 %v568_v23, %v1844_v38  ;;  %v642_v23 = vmul.f32 %v1680_v55, %v1680_v55  ;;  %v643_v38 = vmul.f32 %v1686_v58, %v1686_v58 }
 0x144   :  { %v570_v25 = vadd.f32 %v569_v22, %v1668_v48  ;;  %v702_v26 = vadd.f32 %v701_v18, %v639_v20  ;;  %v1868_v22 = vpop.f32.mrf.mxu2  ;;  %v644_v18 = vmul.f32 %v1696_v63, %v1696_v63 }
 0x146   :  { %v571_v28 = vadd.f32 %v570_v25, %v1674_v52  ;;  %v703_v33 = vadd.f32 %v702_v26, %v640_v24  ;;  %v1873_v25 = vpop.f32.mrf.mxu3  ;;  %v645_v26 = vmul.f32 %v1704_v3, %v1704_v3 }
 0x147   :  { %2487 = vst [vmem:[#allocation28_spill] sm:$0xff] %v1873_v25 }
 0x148   :  { %v572_v43 = vadd.f32 %v571_v28, %v1680_v55  ;;  %v704_v9 = vadd.f32 %v703_v33, %v641_v6  ;;  %v646_v33 = vmul.f32 %v1714_v8, %v1714_v8 }
 0x14a   :  { %v573_v30 = vadd.f32 %v572_v43, %v1686_v58  ;;  %v705_v29 = vadd.f32 %v704_v9, %v642_v23  ;;  %v647_v9 = vmul.f32 %v1740_v27, %v1740_v27 }
 0x14c   :  { %v574_v20 = vadd.f32 %v573_v30, %v1696_v63  ;;  %v706_v24 = vadd.f32 %v705_v29, %v643_v38  ;;  %v648_v38 = vmul.f32 %v1765_v17, %v1765_v17 }
 0x14e   :  { %v575_v6 = vadd.f32 %v574_v20, %v1704_v3  ;;  %v707_v28 = vadd.f32 %v706_v24, %v644_v18  ;;  %v1887_v20 = vpop.f32.mrf.mxu2  ;;  %v649_v18 = vmul.f32 %v1786_v49, %v1786_v49 }
 0x14f   :  { %2488 = vst [vmem:[#allocation29_spill] sm:$0xff] %v1887_v20 }
 0x150   :  { %v708_v23 = vadd.f32 %v707_v28, %v645_v26  ;;  %v576_v43 = vadd.f32 %v575_v6, %v1714_v8  ;;  %v1892_v6 = vpop.f32.mrf.mxu3  ;;  %v650_v28 = vmul.f32 %v1807_v39, %v1807_v39 }
 0x151   :  { %2489 = vst [vmem:[#allocation30_spill] sm:$0xff] %v1892_v6 }
 0x152   :  { %v577_v30 = vadd.f32 %v576_v43, %v1740_v27  ;;  %v709_v29 = vadd.f32 %v708_v23, %v646_v33 }
 0x154   :  { %v578_v63 = vadd.f32 %v577_v30, %v1765_v17  ;;  %v710_v58 = vadd.f32 %v709_v29, %v647_v9  ;;  %v651_v9 = vmul.f32 %v1828_v7, %v1828_v7 }
 0x156   :  { %v579_v24 = vadd.f32 %v578_v63, %v1786_v49  ;;  %v711_v26 = vadd.f32 %v710_v58, %v648_v38  ;;  %v652_v58 = vmul.f32 %v1849_v14, %v1849_v14  ;;  %v653_v49 = vmul.f32 %v1868_v22, %v1868_v22 }
 0x158   :  { %v580_v33 = vadd.f32 %v579_v24, %v1807_v39  ;;  %v712_v23 = vadd.f32 %v711_v26, %v649_v18  ;;  %v1906_v24 = vpop.f32.mrf.mxu2 }
 0x159   :  { %2490 = vst [vmem:[#allocation31_spill] sm:$0xff] %v1906_v24 }
 0x15a   :  { %v581_v43 = vadd.f32 %v580_v33, %v1828_v7  ;;  %v713_v30 = vadd.f32 %v712_v23, %v650_v28  ;;  %v654_v28 = vmul.f32 %v1887_v20, %v1887_v20  ;;  %v1911_v33 = vpop.f32.mrf.mxu3 }
 0x15b   :  { %2491 = vst [vmem:[#allocation32_spill] sm:$0xff] %v1911_v33 }
 0x15c   :  { %v714_v29 = vadd.f32 %v713_v30, %v651_v9  ;;  %v582_v17 = vadd.f32 %v581_v43, %v1849_v14  ;;  %v655_v9 = vmul.f32 %v1906_v24, %v1906_v24 }
 0x15e   :  { %v715_v63 = vadd.f32 %v714_v29, %v652_v58  ;;  %v583_v38 = vadd.f32 %v582_v17, %v1868_v22  ;;  %v656_v17 = vmul.f32 %v1690_v60, %v1690_v60 }
 0x160   :  { %v716_v18 = vadd.f32 %v715_v63, %v653_v49  ;;  %v584_v26 = vadd.f32 %v583_v38, %v1887_v20  ;;  %v657_v49 = vmul.f32 %v1698_v0, %v1698_v0  ;;  %v658_v38 = vmul.f32 %v1706_v4, %v1706_v4 }
 0x162   :  { %v717_v23 = vadd.f32 %v716_v18, %v654_v28  ;;  %v585_v43 = vadd.f32 %v584_v26, %v1906_v24  ;;  %v659_v28 = vmul.f32 %v1722_v12, %v1722_v12 }
 0x164   :  { %v586_v30 = vadd.f32 %v585_v43, %v1690_v60  ;;  %v718_v29 = vadd.f32 %v717_v23, %v655_v9  ;;  %v1928_v43 = vpop.f32.mrf.mxu3  ;;  %v660_v23 = vmul.f32 %v1747_v32, %v1747_v32 }
 0x165   :  { %2492 = vst [vmem:[#allocation33_spill] sm:$0xff] %v1928_v43 }
 0x166   :  { %v587_v58 = vadd.f32 %v586_v30, %v1698_v0  ;;  %v719_v63 = vadd.f32 %v718_v29, %v656_v17  ;;  %v661_v30 = vmul.f32 %v1770_v21, %v1770_v21 }
 0x168   :  { %v588_v18 = vadd.f32 %v587_v58, %v1706_v4  ;;  %v720_v26 = vadd.f32 %v719_v63, %v657_v49  ;;  %v662_v58 = vmul.f32 %v1791_v13, %v1791_v13 }
 0x16a   :  { %v589_v24 = vadd.f32 %v588_v18, %v1722_v12  ;;  %v721_v20 = vadd.f32 %v720_v26, %v658_v38  ;;  %v663_v18 = vmul.f32 %v1812_v11, %v1812_v11 }
 0x16c   :  { %v590_v9 = vadd.f32 %v589_v24, %v1747_v32  ;;  %v722_v17 = vadd.f32 %v721_v20, %v659_v28  ;;  %v664_v20 = vmul.f32 %v1833_v19, %v1833_v19 }
 0x16e   :  { %v591_v29 = vadd.f32 %v590_v9, %v1770_v21  ;;  %v723_v49 = vadd.f32 %v722_v17, %v660_v23  ;;  %v534_v9 = vpop.f32.mrf.mxu3  ;;  %v665_v23 = vmul.f32 %v1854_v2, %v1854_v2 }
 0x170   :  { %v724_v63 = vadd.f32 %v723_v49, %v661_v30  ;;  %v592_v38 = vadd.f32 %v591_v29, %v1791_v13  ;;  %v666_v29 = vmul.f32 %v1873_v25, %v1873_v25 }
 0x172   :  { %v593_v26 = vadd.f32 %v592_v38, %v1812_v11  ;;  %v725_v12 = vadd.f32 %v724_v63, %v662_v58  ;;  %v667_v63 = vmul.f32 %v1892_v6, %v1892_v6 }
 0x174   :  { %v594_v24 = vadd.f32 %v593_v26, %v1833_v19  ;;  %v726_v28 = vadd.f32 %v725_v12, %v663_v18  ;;  %v668_v19 = vmul.f32 %v1911_v33, %v1911_v33 }
 0x176   :  { %v595_v17 = vadd.f32 %v594_v24, %v1854_v2  ;;  %v727_v30 = vadd.f32 %v726_v28, %v664_v20  ;;  %v669_v28 = vmul.f32 %v1928_v43, %v1928_v43 }
 0x178   :  { %v596_v49 = vadd.f32 %v595_v17, %v1873_v25  ;;  %v728_v38 = vadd.f32 %v727_v30, %v665_v23  ;;  %v536_v17 = vpop.f32.mrf.mxu3 }
 0x17a   :  { %v597_v58 = vadd.f32 %v596_v49, %v1892_v6  ;;  %v729_v26 = vadd.f32 %v728_v38, %v666_v29  ;;  %v670_v49 = vmul.f32 %v534_v9, %v534_v9  ;;  %v671_v6 = vmul.f32 %v536_v17, %v536_v17 }
 0x17c   :  { %v730_v12 = vadd.f32 %v729_v26, %v667_v63  ;;  %v598_v18 = vadd.f32 %v597_v58, %v1911_v33 }
 0x17e   :  { %v731_v24 = vadd.f32 %v730_v12, %v668_v19  ;;  %v599_v20 = vadd.f32 %v598_v18, %v1928_v43 }
 0x180   :  { %v732_v23 = vadd.f32 %v731_v24, %v669_v28  ;;  %v600_v30 = vadd.f32 %v599_v20, %v534_v9 }
 0x182   :  { %v733_v25 = vadd.f32 %v732_v23, %v670_v49  ;;  %v601_v2 = vadd.f32 %v600_v30, %v536_v17 }
 0x184   :  { %v602_v29 = vrot.slane %v601_v2, 4  ;;  %v734_v38 = vadd.f32 %v733_v25, %v671_v6 }
 0x186   :  { %v603_v63 = vadd.f32 %v602_v29, %v601_v2  ;;  %v735_v58 = vrot.slane %v734_v38, 4 }
 0x188   :  { %v604_v26 = vrot.slane %v603_v63, 2  ;;  %v736_v11 = vadd.f32 %v735_v58, %v734_v38 }
 0x18a   :  { %v605_v33 = vadd.f32 %v604_v26, %v603_v63  ;;  %v737_v19 = vrot.slane %v736_v11, 2 }
 0x18c   :  { %v606_v12 = vrot.slane %v605_v33, 1  ;;  %v738_v18 = vadd.f32 %v737_v19, %v736_v11  ;;  %v746_v11 = vld [vmem:[%s2444_s2] sm:$0x1]  ;;  %s1612_s2 = smov [#allocation7]  }
 0x18e   :  { %v607_v13 = vadd.f32 %v606_v12, %v605_v33  ;;  %v739_v21 = vrot.slane %v738_v18, 1 }
 0x190   :  { %v740_v43 = vadd.f32 %v739_v21, %v738_v18  ;;  %v741_v32 = vmul.f32 0.001953125, %v607_v13 }
 0x192   :  { %v742_v24 = vmul.f32 0.001953125, %v740_v43  ;;  %v743_v20 = vmul.f32 %v741_v32, %v741_v32  ;;  %v759_v43 = vld [vmem:[%s2445_s3] sm:$0x1]  ;;  %s1092_s3 = sshll.u32 %s1612_s2, 4  ;;  %s1093_s3 = int_to_ptr.vmem [resolvable:$true] %s1092_s3 }
 0x194   :  { %v744_v28 = vsub.f32 %v742_v24, %v743_v20 }
 0x196   :  { %v745_v23 = vmax.f32 %v744_v28, 0.0 }
 0x198   :  { %v747_v30 = vadd.f32 1e-05, %v745_v23 }
 0x19a   :  { %1528 = vrsqrt.f32 %v747_v30  ;;  %vm754_vm1 = vweird.f32 %v747_v30 }
 0x1a0   :  { %v1529_v49 = vpop.eup %1528 }
 0x1a1   :  { %v749_v25 = vmul.f32 %v1529_v49, %v747_v30  ;;  %vm755_vm0 = vweird.f32 %v1529_v49 }
 0x1a2   :  { %vm756_vm2 = vmor %vm754_vm1, %vm755_vm0 }
 0x1a3   :  { %v750_v2 = vmul.f32 %v1529_v49, %v749_v25 }
 0x1a5   :  { %v751_v6 = vmul.f32 0.5, %v750_v2 }
 0x1a7   :  { %v752_v29 = vsub.f32 1.5, %v751_v6  ;;  %v2495_v6 = vld [vmem:[#allocation16_spill] sm:$0xff] }
 0x1a9   :  { %v753_v33 = vmul.f32 %v1529_v49, %v752_v29  ;;  %v2496_v29 = vld [vmem:[#allocation22_spill] sm:$0xff] }
 0x1ab   :  { %v757_v21 = vsel %vm756_vm2, %v1529_v49, %v753_v33  ;;  %v2497_v33 = vld [vmem:[#allocation24_spill] sm:$0xff] }
 0x1ac   :  { %v758_v13 = vmul.f32 %v757_v21, %v746_v11 }
 0x1ae   :  { %v760_v38 = vmul.f32 %v758_v13, %v741_v32  ;;  %v1966_v63 = vperm.slane %v758_v13, 0  ;;  %v2498_v13 = vld [vmem:[#allocation26_spill] sm:$0xff] }
 0x1b0   :  { %v761_v58 = vsub.f32 %v759_v43, %v760_v38  ;;  %v827_v26 = vmul.f32 %v1966_v63, %v534_v9  ;;  %v828_v19 = vmul.f32 %v1966_v63, %v536_v17  ;;  %v765_v32 = vmul.f32 %v1966_v63, %v1650_v36 }
 0x1b1   :  { %v766_v30 = vmul.f32 %v1966_v63, %v1654_v40  ;;  %v767_v9 = vmul.f32 %v1966_v63, %v1658_v42  ;;  %v768_v17 = vmul.f32 %v1966_v63, %v1662_v45  ;;  %v769_v49 = vmul.f32 %v1966_v63, %v1666_v47 }
 0x1b2   :  { %v1970_v12 = vperm.slane %v761_v58, 0  ;;  %v770_v25 = vmul.f32 %v1966_v63, %v1670_v50  ;;  %v771_v2 = vmul.f32 %v1966_v63, %v1676_v53  ;;  %v772_v36 = vmul.f32 %v1966_v63, %v1682_v56  ;;  %v2499_v58 = vld [vmem:[#allocation11_spill] sm:$0xff] }
 0x1b3   :  { %v773_v40 = vmul.f32 %v1966_v63, %v1688_v59  ;;  %v774_v42 = vmul.f32 %v1966_v63, %v1694_v62  ;;  %v775_v45 = vmul.f32 %v1966_v63, %v1700_v1  ;;  %v776_v47 = vmul.f32 %v1966_v63, %v1708_v5 }
 0x1b4   :  { %v894_v18 = vadd.f32 %v1970_v12, %v827_v26  ;;  %v895_v24 = vadd.f32 %v1970_v12, %v828_v19  ;;  %v2000_v50 = vmul.f32 %v1966_v63, %v1727_v16  ;;  %v2004_v53 = vmul.f32 %v1966_v63, %v1745_v31  ;;  %v2500_v19 = vld [vmem:[#allocation12_spill] sm:$0xff] }
 0x1b5   :  { %v2008_v56 = vmul.f32 %v1966_v63, %v1763_v15  ;;  %v2012_v59 = vmul.f32 %v1966_v63, %v1779_v34  ;;  %v2016_v62 = vmul.f32 %v1966_v63, %v1652_v37  ;;  %v2020_v1 = vmul.f32 %v1966_v63, %v1656_v41  ;;  %v2493_v15 = vld [vmem:[#allocation13_spill] sm:$0xff]  ;;  %v2494_v34 = vld [vmem:[#allocation14_spill] sm:$0xff] }
 0x1b6   :  { %v958_v20 = vmax.f32 %v894_v18, 0.0  ;;  %v959_v28 = vmax.f32 %v895_v24, 0.0  ;;  %v2024_v5 = vmul.f32 %v1966_v63, %v1660_v44  ;;  %v2028_v16 = vmul.f32 %v1966_v63, %v1664_v46  ;;  %v2502_v24 = vld [vmem:[#allocation18_spill] sm:$0xff] }
 0x1b7   :  { %v2032_v31 = vmul.f32 %v1966_v63, %v1672_v51  ;;  %v2036_v37 = vmul.f32 %v1966_v63, %v1678_v54  ;;  %v2040_v41 = vmul.f32 %v1966_v63, %v1684_v57  ;;  %v2044_v44 = vmul.f32 %v1966_v63, %v1692_v61 }
 0x1b8   :  { %v1466_v23 = vpack.c.bf16 %v959_v28, %v958_v20  ;;  %v2048_v46 = vmul.f32 %v1966_v63, %v2493_v15  ;;  %v2052_v51 = vmul.f32 %v1966_v63, %v2494_v34  ;;  %v2056_v54 = vmul.f32 %v1966_v63, %v2495_v6  ;;  %v2504_v28 = vld [vmem:[#allocation20_spill] sm:$0xff]  ;;  %v2510_v34 = vld [vmem:[#allocation29_spill] sm:$0xff] }
 0x1b9   :  { %v2060_v57 = vmul.f32 %v1966_v63, %v1758_v10  ;;  %v2064_v61 = vmul.f32 %v1966_v63, %v1781_v35  ;;  %v2068_v11 = vmul.f32 %v1966_v63, %v2496_v29  ;;  %v2072_v21 = vmul.f32 %v1966_v63, %v2497_v33  ;;  %v2511_v29 = vld [vmem:[#allocation31_spill] sm:$0xff] }
 0x1ba   :  { %1498 = vst [vmem:[#allocation7 + $0xf8] sm:$0xff] %v1466_v23   ;;  %v2076_v43 = vmul.f32 %v1966_v63, %v2498_v13  ;;  %v2080_v10 = vmul.f32 %v1966_v63, %v1668_v48  ;;  %v2084_v35 = vmul.f32 %v1966_v63, %v1674_v52  ;;  %v2088_v38 = vmul.f32 %v1966_v63, %v1680_v55  ;;  %v2512_v13 = vld [vmem:[#allocation15_spill] sm:$0xff] }
 0x1bb   :  { %v2092_v26 = vmul.f32 %v1966_v63, %v2499_v58  ;;  %v2096_v18 = vmul.f32 %v1966_v63, %v2500_v19  ;;  %v2100_v48 = vmul.f32 %v1966_v63, %v1704_v3  ;;  %v2104_v52 = vmul.f32 %v1966_v63, %v1714_v8 }
 0x1bc   :  { %v2108_v55 = vmul.f32 %v1966_v63, %v1740_v27  ;;  %v2112_v20 = vmul.f32 %v1966_v63, %v2502_v24  ;;  %v2116_v23 = vmul.f32 %v1966_v63, %v2504_v28  ;;  %v2120_v3 = vmul.f32 %v1966_v63, %v1807_v39  ;;  %v2514_v24 = vld [vmem:[#allocation19_spill] sm:$0xff] }
 0x1bd   :  { %v2124_v8 = vmul.f32 %v1966_v63, %v1828_v7  ;;  %v2128_v27 = vmul.f32 %v1966_v63, %v1849_v14  ;;  %v2132_v15 = vmul.f32 %v1966_v63, %v1868_v22  ;;  %v811_v6 = vmul.f32 %v1966_v63, %v2510_v34  ;;  %v2513_v22 = vld [vmem:[#allocation17_spill] sm:$0xff] }
 0x1be   :  { %2501 = vst [vmem:[#allocation13_spill] sm:$0xff] %v2108_v55  ;;  %v812_v33 = vmul.f32 %v1966_v63, %v2511_v29  ;;  %v813_v39 = vmul.f32 %v1966_v63, %v1690_v60  ;;  %v814_v7 = vmul.f32 %v1966_v63, %v1698_v0  ;;  %v815_v14 = vmul.f32 %v1966_v63, %v1706_v4  ;;  %v2515_v34 = vld [vmem:[#allocation21_spill] sm:$0xff] }
 0x1bf   :  { %2503 = vst [vmem:[#allocation14_spill] sm:$0xff] %v2112_v20  ;;  %v816_v58 = vmul.f32 %v1966_v63, %v2512_v13  ;;  %v817_v19 = vmul.f32 %v1966_v63, %v2513_v22  ;;  %v818_v28 = vmul.f32 %v1966_v63, %v2514_v24  ;;  %v819_v29 = vmul.f32 %v1966_v63, %v2515_v34  ;;  %v2521_v20 = vld [vmem:[#allocation32_spill] sm:$0xff]  ;;  %v2522_v55 = vld [vmem:[#allocation33_spill] sm:$0xff] }
 0x1c0   :  { %2505 = vst [vmem:[#allocation16_spill] sm:$0xff] %v2116_v23  ;;  %v2520_v23 = vld [vmem:[#allocation30_spill] sm:$0xff]  ;;  %v825_v24 = vmul.f32 %v1966_v63, %v2521_v20  ;;  %v826_v34 = vmul.f32 %v1966_v63, %v2522_v55  ;;  %v2182_v20 = vadd.f32 %v1970_v12, %v770_v25  ;;  %v2203_v25 = vadd.f32 %v1970_v12, %v811_v6 }
 0x1c1   :  { %2506 = vst [vmem:[#allocation22_spill] sm:$0xff] %v2120_v3  ;;  %v2519_v3 = vld [vmem:[#allocation28_spill] sm:$0xff]  ;;  %v824_v22 = vmul.f32 %v1966_v63, %v2520_v23  ;;  %v2179_v23 = vadd.f32 %v1970_v12, %v769_v49  ;;  %v2200_v49 = vadd.f32 %v1970_v12, %v776_v47  ;;  %v2221_v47 = vadd.f32 %v1970_v12, %v817_v19 }
 0x1c2   :  { %2507 = vst [vmem:[#allocation24_spill] sm:$0xff] %v2124_v8  ;;  %v2518_v8 = vld [vmem:[#allocation27_spill] sm:$0xff]  ;;  %v823_v13 = vmul.f32 %v1966_v63, %v2519_v3  ;;  %v2176_v3 = vadd.f32 %v1970_v12, %v768_v17  ;;  %v2197_v17 = vadd.f32 %v1970_v12, %v775_v45  ;;  %v2218_v45 = vadd.f32 %v1970_v12, %v816_v58 }
 0x1c3   :  { %2508 = vst [vmem:[#allocation26_spill] sm:$0xff] %v2128_v27  ;;  %v2517_v27 = vld [vmem:[#allocation25_spill] sm:$0xff]  ;;  %v822_v4 = vmul.f32 %v1966_v63, %v2518_v8  ;;  %v2173_v8 = vadd.f32 %v1970_v12, %v767_v9  ;;  %v2194_v9 = vadd.f32 %v1970_v12, %v774_v42  ;;  %v2215_v42 = vadd.f32 %v1970_v12, %v815_v14 }
 0x1c4   :  { %2509 = vst [vmem:[#allocation11_spill] sm:$0xff] %v2132_v15  ;;  %v2516_v15 = vld [vmem:[#allocation23_spill] sm:$0xff]  ;;  %v821_v0 = vmul.f32 %v1966_v63, %v2517_v27  ;;  %v2170_v27 = vadd.f32 %v1970_v12, %v766_v30  ;;  %v2191_v30 = vadd.f32 %v1970_v12, %v773_v40  ;;  %v2212_v40 = vadd.f32 %v1970_v12, %v814_v7 }
 0x1c5   :  { %v820_v60 = vmul.f32 %v1966_v63, %v2516_v15  ;;  %v2167_v15 = vadd.f32 %v1970_v12, %v765_v32  ;;  %v2185_v63 = vadd.f32 %v1970_v12, %v771_v2  ;;  %v2188_v32 = vadd.f32 %v1970_v12, %v772_v36 }
 0x1c6   :  { %v2206_v2 = vadd.f32 %v1970_v12, %v812_v33  ;;  %v2209_v36 = vadd.f32 %v1970_v12, %v813_v39  ;;  %v2224_v55 = vadd.f32 %v1970_v12, %v818_v28  ;;  %v2227_v6 = vadd.f32 %v1970_v12, %v819_v29 }
 0x1c7   :  { %v2230_v33 = vadd.f32 %v1970_v12, %v820_v60  ;;  %v2233_v39 = vadd.f32 %v1970_v12, %v821_v0  ;;  %v2236_v7 = vadd.f32 %v1970_v12, %v822_v4  ;;  %v2239_v14 = vadd.f32 %v1970_v12, %v823_v13 }
 0x1c8   :  { %v2242_v58 = vadd.f32 %v1970_v12, %v824_v22  ;;  %v2245_v19 = vadd.f32 %v1970_v12, %v825_v24  ;;  %v2249_v28 = vadd.f32 %v1970_v12, %v2000_v50  ;;  %v2253_v29 = vadd.f32 %v1970_v12, %v2004_v53  ;;  %v2527_v22 = vld [vmem:[#allocation13_spill] sm:$0xff]  ;;  %v2529_v24 = vld [vmem:[#allocation14_spill] sm:$0xff] }
 0x1c9   :  { %v2257_v60 = vadd.f32 %v1970_v12, %v2008_v56  ;;  %v2260_v0 = vadd.f32 %v1970_v12, %v826_v34  ;;  %v2264_v4 = vadd.f32 %v1970_v12, %v2012_v59  ;;  %v2268_v13 = vadd.f32 %v1970_v12, %v2016_v62  ;;  %v2531_v34 = vld [vmem:[#allocation16_spill] sm:$0xff] }
 0x1ca   :  { %v2272_v50 = vadd.f32 %v1970_v12, %v2020_v1  ;;  %v2276_v53 = vadd.f32 %v1970_v12, %v2024_v5  ;;  %v2280_v56 = vadd.f32 %v1970_v12, %v2028_v16  ;;  %v2284_v59 = vadd.f32 %v1970_v12, %v2032_v31 }
 0x1cb   :  { %v2288_v62 = vadd.f32 %v1970_v12, %v2036_v37  ;;  %v2292_v1 = vadd.f32 %v1970_v12, %v2040_v41  ;;  %v2296_v5 = vadd.f32 %v1970_v12, %v2044_v44  ;;  %v2300_v16 = vadd.f32 %v1970_v12, %v2048_v46 }
 0x1cc   :  { %v2304_v31 = vadd.f32 %v1970_v12, %v2052_v51  ;;  %v2308_v37 = vadd.f32 %v1970_v12, %v2056_v54  ;;  %v2312_v41 = vadd.f32 %v1970_v12, %v2060_v57  ;;  %v2316_v44 = vadd.f32 %v1970_v12, %v2064_v61 }
 0x1cd   :  { %v2320_v46 = vadd.f32 %v1970_v12, %v2068_v11  ;;  %v2324_v51 = vadd.f32 %v1970_v12, %v2072_v21  ;;  %v2328_v54 = vadd.f32 %v1970_v12, %v2076_v43  ;;  %v2332_v57 = vadd.f32 %v1970_v12, %v2080_v10 }
 0x1ce   :  { %v2336_v61 = vadd.f32 %v1970_v12, %v2084_v35  ;;  %v2340_v11 = vadd.f32 %v1970_v12, %v2088_v38  ;;  %v2344_v21 = vadd.f32 %v1970_v12, %v2092_v26  ;;  %v2348_v43 = vadd.f32 %v1970_v12, %v2096_v18 }
 0x1cf   :  { %v2352_v10 = vadd.f32 %v1970_v12, %v2100_v48  ;;  %v2356_v35 = vadd.f32 %v1970_v12, %v2104_v52  ;;  %v2360_v38 = vadd.f32 %v1970_v12, %v2527_v22  ;;  %v2364_v26 = vadd.f32 %v1970_v12, %v2529_v24 }
 0x1d0   :  { %2523 = vst [vmem:[#allocation12_spill] sm:$0xff] %v2344_v21  ;;  %v2368_v18 = vadd.f32 %v1970_v12, %v2531_v34  ;;  %v897_v48 = vmax.f32 %v2170_v27, 0.0  ;;  %v899_v52 = vmax.f32 %v2176_v3, 0.0  ;;  %v901_v22 = vmax.f32 %v2182_v20, 0.0 }
 0x1d1   :  { %2524 = vst [vmem:[#allocation18_spill] sm:$0xff] %v2348_v43  ;;  %v896_v43 = vmax.f32 %v2167_v15, 0.0  ;;  %v903_v24 = vmax.f32 %v2188_v32, 0.0  ;;  %v905_v34 = vmax.f32 %v2194_v9, 0.0  ;;  %v906_v15 = vmax.f32 %v2197_v17, 0.0 }
 0x1d2   :  { %2525 = vst [vmem:[#allocation20_spill] sm:$0xff] %v2352_v10  ;;  %v898_v10 = vmax.f32 %v2173_v8, 0.0  ;;  %v907_v27 = vmax.f32 %v2200_v49, 0.0  ;;  %v908_v8 = vmax.f32 %v2249_v28, 0.0  ;;  %v909_v3 = vmax.f32 %v2253_v29, 0.0 }
 0x1d3   :  { %2526 = vst [vmem:[#allocation29_spill] sm:$0xff] %v2356_v35  ;;  %v900_v35 = vmax.f32 %v2179_v23, 0.0  ;;  %v910_v23 = vmax.f32 %v2257_v60, 0.0  ;;  %v911_v20 = vmax.f32 %v2264_v4, 0.0  ;;  %v913_v32 = vmax.f32 %v2272_v50, 0.0 }
 0x1d4   :  { %2528 = vst [vmem:[#allocation31_spill] sm:$0xff] %v2360_v38  ;;  %v902_v38 = vmax.f32 %v2185_v63, 0.0  ;;  %v912_v63 = vmax.f32 %v2268_v13, 0.0  ;;  %v915_v9 = vmax.f32 %v2280_v56, 0.0  ;;  %v916_v17 = vmax.f32 %v2284_v59, 0.0 }
 0x1d5   :  { %2530 = vst [vmem:[#allocation15_spill] sm:$0xff] %v2364_v26  ;;  %v904_v26 = vmax.f32 %v2191_v30, 0.0  ;;  %v914_v30 = vmax.f32 %v2276_v53, 0.0  ;;  %v917_v49 = vmax.f32 %v2288_v62, 0.0  ;;  %v918_v28 = vmax.f32 %v2292_v1, 0.0 }
 0x1d6   :  { %2532 = vst [vmem:[#allocation17_spill] sm:$0xff] %v2368_v18  ;;  %v919_v29 = vmax.f32 %v2296_v5, 0.0  ;;  %v920_v60 = vmax.f32 %v2300_v16, 0.0  ;;  %v921_v4 = vmax.f32 %v2304_v31, 0.0  ;;  %v942_v13 = vmax.f32 %v2203_v25, 0.0 }
 0x1d7   :  { %v943_v50 = vmax.f32 %v2206_v2, 0.0  ;;  %v944_v53 = vmax.f32 %v2209_v36, 0.0  ;;  %v945_v56 = vmax.f32 %v2212_v40, 0.0  ;;  %v946_v59 = vmax.f32 %v2215_v42, 0.0 }
 0x1d8   :  { %v947_v62 = vmax.f32 %v2218_v45, 0.0  ;;  %v1311_v18 = vpack.c.bf16 %v897_v48, %v896_v43  ;;  %v948_v1 = vmax.f32 %v2221_v47, 0.0  ;;  %v1316_v5 = vpack.c.bf16 %v899_v52, %v898_v10 }
 0x1d9   :  { %v1321_v21 = vpack.c.bf16 %v901_v22, %v900_v35  ;;  %v1326_v16 = vpack.c.bf16 %v903_v24, %v902_v38  ;;  %v949_v31 = vmax.f32 %v2224_v55, 0.0  ;;  %v950_v25 = vmax.f32 %v2227_v6, 0.0  ;;  %v2533_v22 = vld [vmem:[#allocation22_spill] sm:$0xff] }
 0x1da   :  { %v951_v2 = vmax.f32 %v2230_v33, 0.0  ;;  %1312 = vst [vmem:[#allocation7] sm:$0xff] %v1311_v18   ;;  %v1331_v36 = vpack.c.bf16 %v905_v34, %v904_v26  ;;  %v952_v40 = vmax.f32 %v2233_v39, 0.0  ;;  %v953_v42 = vmax.f32 %v2236_v7, 0.0 }
 0x1db   :  { %v954_v45 = vmax.f32 %v2239_v14, 0.0  ;;  %1468 = vst [vmem:[#allocation7 + $0x8] sm:$0xff] %v1316_v5   ;;  %v1336_v43 = vpack.c.bf16 %v907_v27, %v906_v15  ;;  %v955_v47 = vmax.f32 %v2242_v58, 0.0  ;;  %v956_v10 = vmax.f32 %v2245_v19, 0.0  ;;  %v2534_v27 = vld [vmem:[#allocation24_spill] sm:$0xff] }
 0x1dc   :  { %v957_v55 = vmax.f32 %v2260_v0, 0.0  ;;  %1469 = vst [vmem:[#allocation7 + $0x10] sm:$0xff] %v1321_v21   ;;  %v1341_v6 = vpack.c.bf16 %v909_v3, %v908_v8  ;;  %v922_v33 = vmax.f32 %v2308_v37, 0.0  ;;  %v923_v35 = vmax.f32 %v2312_v41, 0.0 }
 0x1dd   :  { %v924_v39 = vmax.f32 %v2316_v44, 0.0  ;;  %1470 = vst [vmem:[#allocation7 + $0x18] sm:$0xff] %v1326_v16   ;;  %v1346_v7 = vpack.c.bf16 %v911_v20, %v910_v23  ;;  %v1351_v14 = vpack.c.bf16 %v913_v32, %v912_v63  ;;  %v1356_v38 = vpack.c.bf16 %v915_v9, %v914_v30  ;;  %v2535_v20 = vld [vmem:[#allocation26_spill] sm:$0xff]  ;;  %v2536_v30 = vld [vmem:[#allocation12_spill] sm:$0xff]  ;;  %v2537_v9 = vld [vmem:[#allocation11_spill] sm:$0xff] }
 0x1de   :  { %1471 = vst [vmem:[#allocation7 + $0x20] sm:$0xff] %v1331_v36   ;;  %v1426_v26 = vpack.c.bf16 %v943_v50, %v942_v13  ;;  %v1431_v18 = vpack.c.bf16 %v945_v56, %v944_v53  ;;  %v1436_v58 = vpack.c.bf16 %v947_v62, %v946_v59  ;;  %v1441_v19 = vpack.c.bf16 %v949_v31, %v948_v1  ;;  %v2540_v13 = vld [vmem:[#allocation29_spill] sm:$0xff] }
 0x1df   :  { %1472 = vst [vmem:[#allocation7 + $0x28] sm:$0xff] %v1336_v43   ;;  %v1446_v48 = vpack.c.bf16 %v951_v2, %v950_v25  ;;  %v1451_v0 = vpack.c.bf16 %v953_v42, %v952_v40  ;;  %v925_v21 = vmax.f32 %v2320_v46, 0.0  ;;  %v1361_v37 = vpack.c.bf16 %v917_v49, %v916_v17  ;;  %v2538_v49 = vld [vmem:[#allocation18_spill] sm:$0xff]  ;;  %v2543_v59 = vld [vmem:[#allocation17_spill] sm:$0xff] }
 0x1e0   :  { %1473 = vst [vmem:[#allocation7 + $0x30] sm:$0xff] %v1341_v6   ;;  %v1456_v52 = vpack.c.bf16 %v955_v47, %v954_v45  ;;  %v1461_v41 = vpack.c.bf16 %v957_v55, %v956_v10  ;;  %v874_v44 = vadd.f32 %v1970_v12, %v2533_v22  ;;  %v926_v24 = vmax.f32 %v2324_v51, 0.0 }
 0x1e1   :  { %v927_v34 = vmax.f32 %v2328_v54, 0.0  ;;  %1474 = vst [vmem:[#allocation7 + $0x38] sm:$0xff] %v1346_v7   ;;  %v1366_v15 = vpack.c.bf16 %v919_v29, %v918_v28  ;;  %v875_v8 = vadd.f32 %v1970_v12, %v2534_v27  ;;  %v928_v3 = vmax.f32 %v2332_v57, 0.0  ;;  %v2539_v29 = vld [vmem:[#allocation20_spill] sm:$0xff] }
 0x1e2   :  { %v929_v46 = vmax.f32 %v2336_v61, 0.0  ;;  %1475 = vst [vmem:[#allocation7 + $0x40] sm:$0xff] %v1351_v14   ;;  %v1371_v23 = vpack.c.bf16 %v921_v4, %v920_v60  ;;  %v876_v63 = vadd.f32 %v1970_v12, %v2535_v20  ;;  %v930_v32 = vmax.f32 %v2340_v11, 0.0  ;;  %v2541_v4 = vld [vmem:[#allocation31_spill] sm:$0xff] }
 0x1e3   :  { %v931_v51 = vmax.f32 %v2536_v30, 0.0  ;;  %1476 = vst [vmem:[#allocation7 + $0x48] sm:$0xff] %v1356_v38   ;;  %v1376_v54 = vpack.c.bf16 %v923_v35, %v922_v33  ;;  %v877_v17 = vadd.f32 %v1970_v12, %v2537_v9  ;;  %v932_v28 = vmax.f32 %v2538_v49, 0.0  ;;  %v2542_v11 = vld [vmem:[#allocation15_spill] sm:$0xff] }
 0x1e4   :  { %v933_v57 = vmax.f32 %v2539_v29, 0.0  ;;  %1477 = vst [vmem:[#allocation7 + $0x50] sm:$0xff] %v1361_v37   ;;  %v1381_v61 = vpack.c.bf16 %v925_v21, %v924_v39  ;;  %v934_v60 = vmax.f32 %v2540_v13, 0.0  ;;  %v935_v50 = vmax.f32 %v2541_v4, 0.0 }
 0x1e5   :  { %1478 = vst [vmem:[#allocation7 + $0x58] sm:$0xff] %v1366_v15   ;;  %v1386_v53 = vpack.c.bf16 %v927_v34, %v926_v24  ;;  %v936_v56 = vmax.f32 %v2542_v11, 0.0  ;;  %v937_v62 = vmax.f32 %v2543_v59, 0.0  ;;  %v1391_v1 = vpack.c.bf16 %v929_v46, %v928_v3 }
 0x1e6   :  { %1479 = vst [vmem:[#allocation7 + $0x60] sm:$0xff] %v1371_v23   ;;  %v938_v5 = vmax.f32 %v874_v44, 0.0  ;;  %v939_v12 = vmax.f32 %v875_v8, 0.0  ;;  %v1396_v16 = vpack.c.bf16 %v931_v51, %v930_v32  ;;  %v940_v31 = vmax.f32 %v876_v63, 0.0 }
 0x1e7   :  { %1480 = vst [vmem:[#allocation7 + $0x68] sm:$0xff] %v1376_v54   ;;  %v941_v25 = vmax.f32 %v877_v17, 0.0  ;;  %v1401_v2 = vpack.c.bf16 %v933_v57, %v932_v28  ;;  %v1406_v36 = vpack.c.bf16 %v935_v50, %v934_v60  ;;  %v1411_v40 = vpack.c.bf16 %v937_v62, %v936_v56 }
 0x1e8   :  { %1481 = vst [vmem:[#allocation7 + $0x70] sm:$0xff] %v1381_v61   ;;  %v1416_v42 = vpack.c.bf16 %v939_v12, %v938_v5 }
 0x1e9   :  { %1482 = vst [vmem:[#allocation7 + $0x78] sm:$0xff] %v1386_v53   ;;  %v1421_v45 = vpack.c.bf16 %v941_v25, %v940_v31 }
 0x1ea   :  { %1483 = vst [vmem:[#allocation7 + $0x80] sm:$0xff] %v1391_v1  }
 0x1eb   :  { %1484 = vst [vmem:[#allocation7 + $0x88] sm:$0xff] %v1396_v16  }
 0x1ec   :  { %1485 = vst [vmem:[#allocation7 + $0x90] sm:$0xff] %v1401_v2  }
 0x1ed   :  { %1486 = vst [vmem:[#allocation7 + $0x98] sm:$0xff] %v1406_v36  }
 0x1ee   :  { %1487 = vst [vmem:[#allocation7 + $0xa0] sm:$0xff] %v1411_v40  }
 0x1ef   :  { %1488 = vst [vmem:[#allocation7 + $0xa8] sm:$0xff] %v1416_v42  }
 0x1f0   :  { %1489 = vst [vmem:[#allocation7 + $0xb0] sm:$0xff] %v1421_v45  }
 0x1f1   :  { %1490 = vst [vmem:[#allocation7 + $0xb8] sm:$0xff] %v1426_v26  }
 0x1f2   :  { %1491 = vst [vmem:[#allocation7 + $0xc0] sm:$0xff] %v1431_v18  }
 0x1f3   :  { %1492 = vst [vmem:[#allocation7 + $0xc8] sm:$0xff] %v1436_v58  }
 0x1f4   :  { %1493 = vst [vmem:[#allocation7 + $0xd0] sm:$0xff] %v1441_v19  }
 0x1f5   :  { %1494 = vst [vmem:[#allocation7 + $0xd8] sm:$0xff] %v1446_v48  }
 0x1f6   :  { %1495 = vst [vmem:[#allocation7 + $0xe0] sm:$0xff] %v1451_v0  }
 0x1f7   :  { %1496 = vst [vmem:[#allocation7 + $0xe8] sm:$0xff] %v1456_v52  }
 0x1f8   :  { %1497 = vst [vmem:[#allocation7 + $0xf0] sm:$0xff] %v1461_v41  }
 0x1f9   :  { %1100 = dma.vmem_to_hbm [thread:$0]  %s1093_s3, 4096, %s1095_s5, [#allocation4], %s1609_s23, %s1609_s23, %s1610_s24  }
 0x1fa   :  { %1606 = dma.done.wait [#allocation4], 4096  }
 0x1fb   :  { %1607 = vsyncadd [#allocation4], 4294963200 }
 0x1fc   :  { %1105 = vsyncpa [#allocation3], 1 }
 0x1fd   :  { %1106 = vsyncpa [#allocation6], 1 }
 0x1fe   :  { %1107 = vsyncpa [#allocation4], 1 }

</bundles_post_ra>
